<compile_context>
chip_gen: v6e
topology: v6e:2x2x1
jax: 0.10.0
libtpu: 0.0.40
codegen_flags: <defaults>
</compile_context>

<pallas_src>
import functools

import jax
import jax.numpy as jnp
from jax.experimental import pallas as pl
from jax.experimental.pallas import tpu as pltpu


# ----------------------------- Pallas kernel ------------------------------- #
def _kan_kernel(x_ref,        # [tile_rows, in_feat]   bf16 (pre-cast)
                w_in_ref,     # [in_feat, H]           bf16 (BN scale folded in)
                sh_in_ref,    # [1, H]                 epilogue dtype
                w_l_ref,      # [L, H, H]              bf16 (BN scale folded in)
                sh_l_ref,     # [L, 1, H]              epilogue dtype
                w_out_ref,    # [H, OUT_PAD]           bf16 (1/W folded, padded)
                b_out_ref,    # [1, OUT_PAD]           f32
                o_ref,        # [bpt, OUT_PAD]         f32
                *, window, epilogue_dtype):

    def act(h_f32, shift):
        # BN shift (+ folded linear bias) and LeakyReLU(0.1) as mul+max:
        # 2 VALU ops per element. Runs in bf16 on v6e/v7x, f32 on v5e/older.
        t = h_f32.astype(epilogue_dtype) + shift
        return jnp.maximum(t, 0.1 * t)

    rows = x_ref.shape[0]            # static: batches_per_tile * window
    hidden = w_in_ref.shape[1]
    num_layers = w_l_ref.shape[0]

    # Input projection: MXU, bf16 operands, f32 accumulation.
    h = act(jnp.dot(x_ref[...], w_in_ref[...],
                    preferred_element_type=jnp.float32),
            sh_in_ref[...])

    # Stacked NaiveKANLayer (time-distributed Linear) + BN(eval) + LeakyReLU.
    for l in range(num_layers):
        h = act(jnp.dot(h.astype(jnp.bfloat16), w_l_ref[l],
                        preferred_element_type=jnp.float32),
                sh_l_ref[l])

    # Global average pooling over the window axis: cast to f32 first (so the
    # reshape splits the f32 sublane dim on an (8,128)-aligned boundary), then
    # a sublane-group sum.  The 1/window factor is folded into w_out.
    pooled = h.astype(jnp.float32) \
              .reshape(rows // window, window, hidden).sum(axis=1)

    # Output projection against the lane-padded weight -> lane-dense store.
    out = jnp.dot(pooled.astype(jnp.bfloat16), w_out_ref[...],
                  preferred_element_type=jnp.float32)
    o_ref[...] = (out + b_out_ref[...]).astype(o_ref.dtype)


# ------------------------------- Wrapper ------------------------------------ #
def _epilogue_dtype():
    # v2-v5 TPUs have no native bf16 VPU: keep the elementwise epilogue in f32
    # there; v6e/v7x use bf16 (half the VALU slot pressure / vreg footprint).
    try:
        kind = jax.devices()[0].device_kind.lower()
    except Exception:
        return jnp.float32
    for tag in ("v2", "v3", "v4", "v5"):
        if tag in kind:
            return jnp.float32
    return jnp.bfloat16


def _pick_batches_per_tile(batch, window, target_rows=2048):
    # Divisors of B that keep the row tile sublane-aligned:
    #   d % 8 == 0  ->  tile rows (d*W) and output tile rows (d) are multiples of 8
    #   d == B      ->  tile equals the full array (always legal)
    cands = [d for d in range(1, batch + 1)
             if batch % d == 0 and (d % 8 == 0 or d == batch)]
    fitting = [d for d in cands if d * window <= target_rows]
    return max(fitting) if fitting else min(cands)


def kan_forward(x, params, *, batches_per_tile=None):
    """x: [B, W, in_feat] float32. Returns [B, out_feat] (squeeze in caller)."""
    B, W, in_feat = x.shape
    H = params["w_in"].shape[1]
    out_feat = params["w_out"].shape[1]
    L = params["w_l"].shape[0]
    lane = 128
    out_pad = ((out_feat + lane - 1) // lane) * lane  # lane-dense output width

    if batches_per_tile is None:
        batches_per_tile = _pick_batches_per_tile(B, W)
    bpt = batches_per_tile
    assert B % bpt == 0, "batches_per_tile must divide batch"
    tile_rows = bpt * W
    grid = (B // bpt,)

    epi_dtype = _epilogue_dtype()
    epi_bytes = 2 if epi_dtype == jnp.bfloat16 else 4

    # ---- parameter prep (cheap, one-time, XLA-side) ------------------------
    # Fold the eval-mode BN scale into the bf16 MXU weights and the linear
    # bias into the BN shift:  (h@W + b)*s + sh == h @ (W*s) + (b*s + sh).
    w_in = (params["w_in"] * params["s_in"]).astype(jnp.bfloat16)
    w_l = (params["w_l"] * params["s_l"]).astype(jnp.bfloat16)
    sh_in = (params["b_in"] * params["s_in"] + params["sh_in"]).astype(epi_dtype)
    sh_l = (params["b_l"] * params["s_l"] + params["sh_l"]).astype(epi_dtype)

    # Fold the 1/window mean factor into the output projection (kernel pools
    # with a sum) and lane-pad it so the final store is an unmasked vst.
    w_out_p = jnp.zeros((H, out_pad), jnp.float32)
    w_out_p = w_out_p.at[:, :out_feat].set(params["w_out"] / W).astype(jnp.bfloat16)
    b_out_p = jnp.zeros((1, out_pad), jnp.float32)
    b_out_p = b_out_p.at[:, :out_feat].set(params["b_out"])

    # Pre-cast activations to bf16: halves streamed DMA bytes and drops the
    # per-tile f32->bf16 pack in the kernel.
    x2d = x.reshape(B * W, in_feat).astype(jnp.bfloat16)

    # TODO(synk): at production H/L on v7x, give the resident-weight specs
    # pipeline_mode=pl.Buffered(1) so they are not double-buffered in VMEM.
    in_specs = [
        pl.BlockSpec((tile_rows, in_feat), lambda i: (i, 0)),   # streamed rows
        pl.BlockSpec((in_feat, H), lambda i: (0, 0)),           # resident weights
        pl.BlockSpec((1, H), lambda i: (0, 0)),
        pl.BlockSpec((L, H, H), lambda i: (0, 0, 0)),
        pl.BlockSpec((L, 1, H), lambda i: (0, 0, 0)),
        pl.BlockSpec((H, out_pad), lambda i: (0, 0)),
        pl.BlockSpec((1, out_pad), lambda i: (0, 0)),
    ]
    out_specs = pl.BlockSpec((bpt, out_pad), lambda i: (i, 0))

    # VMEM budget: double-buffered streamed tiles + (double-buffered) resident
    # weights + live activations; cap at 32 MiB to stay friendly to v7x (64
    # MiB physical / 32 MiB scoped default per TensorCore).
    tile_io = tile_rows * in_feat * 2 + bpt * out_pad * 4
    weight_bytes = ((w_in.size + w_l.size + w_out_p.size) * 2
                    + (sh_in.size + sh_l.size) * epi_bytes
                    + b_out_p.size * 4)
    live_bytes = 3 * tile_rows * H * 4
    est = 2 * tile_io + 2 * weight_bytes + live_bytes
    vmem_limit = int(min(32 * 2**20, max(8 * 2**20, 2 * est)))

    flops = int(2 * B * W * (in_feat * H + L * H * H) + 2 * B * H * out_pad)
    bytes_accessed = int(x2d.size * 2 + weight_bytes + B * out_pad * 4)

    out = pl.pallas_call(
        functools.partial(_kan_kernel, window=W, epilogue_dtype=epi_dtype),
        out_shape=jax.ShapeDtypeStruct((B, out_pad), jnp.float32),
        grid=grid,
        in_specs=in_specs,
        out_specs=out_specs,
        compiler_params=pltpu.CompilerParams(
            dimension_semantics=("parallel",),   # shard row tiles across TCs
            vmem_limit_bytes=vmem_limit),
        cost_estimate=pl.CostEstimate(
            flops=flops, transcendentals=0, bytes_accessed=bytes_accessed),
    )(x2d, w_in, sh_in, w_l, sh_l, w_out_p, b_out_p)
    return out[:, :out_feat]


# ---------------------- Deterministic parameter setup ----------------------- #
def make_params(key, in_feat, hidden_feat, out_feat, num_layers):
    ks = jax.random.split(key, 8)
    eps = 1e-5

    def bn_fold(k, n):
        kg, kb, km, kv = jax.random.split(k, 4)
        gamma = 0.5 + jax.random.uniform(kg, (1, n), jnp.float32)        # > 0
        beta = 0.1 * jax.random.normal(kb, (1, n), jnp.float32)
        running_mean = 0.1 * jax.random.normal(km, (1, n), jnp.float32)
        running_var = 0.5 + jax.random.uniform(kv, (1, n), jnp.float32)  # > 0
        scale = gamma / jnp.sqrt(running_var + eps)
        shift = beta - running_mean * scale
        return scale, shift

    w_in = 0.1 * jax.random.normal(ks[0], (in_feat, hidden_feat), jnp.float32)
    b_in = 0.1 * jax.random.normal(ks[1], (1, hidden_feat), jnp.float32)
    s_in, sh_in = bn_fold(ks[2], hidden_feat)

    w_l = 0.1 * jax.random.normal(
        ks[3], (num_layers, hidden_feat, hidden_feat), jnp.float32)
    b_l = 0.1 * jax.random.normal(
        ks[4], (num_layers, 1, hidden_feat), jnp.float32)
    kbn = jax.random.split(ks[5], num_layers)
    s_list, sh_list = [], []
    for l in range(num_layers):
        s, sh = bn_fold(kbn[l], hidden_feat)
        s_list.append(s)
        sh_list.append(sh)
    s_l = jnp.stack(s_list)      # [L, 1, H]
    sh_l = jnp.stack(sh_list)    # [L, 1, H]

    w_out = 0.1 * jax.random.normal(ks[6], (hidden_feat, out_feat), jnp.float32)
    b_out = 0.1 * jax.random.normal(ks[7], (1, out_feat), jnp.float32)

    return dict(w_in=w_in, b_in=b_in, s_in=s_in, sh_in=sh_in,
                w_l=w_l, b_l=b_l, s_l=s_l, sh_l=sh_l,
                w_out=w_out, b_out=b_out)


# ------------------------------ Pure-JAX reference --------------------------- #
def kan_reference(x, params):
    B, W, _ = x.shape

    def leaky(h):
        return jnp.where(h > 0, h, 0.1 * h)

    h = x.reshape(B * W, -1) @ params["w_in"] + params["b_in"]
    h = h * params["s_in"] + params["sh_in"]
    h = leaky(h)
    for l in range(params["w_l"].shape[0]):
        h = h @ params["w_l"][l] + params["b_l"][l]
        h = h * params["s_l"][l] + params["sh_l"][l]
        h = leaky(h)
    h = h.reshape(B, W, -1).mean(axis=1)
    out = h @ params["w_out"] + params["b_out"]
    return out


# ---------------------------------- Main ------------------------------------- #
if __name__ == "__main__":
    B, W = 16, 8
    in_feat, hidden_feat, out_feat = 16, 32, 1
    num_layers = 2

    x = jax.random.normal(jax.random.PRNGKey(0), (B, W, in_feat), jnp.float32)
    params = make_params(jax.random.PRNGKey(42), in_feat, hidden_feat,
                         out_feat, num_layers)

    # Default heuristic picks bpt = B = 16 -> 128-row tile, single grid step
    # (no pipeline prologue/epilogue overhead at this toy size).
    out = kan_forward(x, params)
    out = jax.block_until_ready(out)

    ref = kan_reference(x, params)
    # bf16 MXU operands, folded-scale bf16 weights, and (on v6e/v7x) a bf16
    # elementwise epilogue: allow small compounded cast error vs the f32 ref.
    if not jnp.allclose(out, ref, atol=3e-2, rtol=3e-2):
        raise AssertionError(f"mismatch: pallas={out} ref={ref}")

    # Match PyTorch's .squeeze() on [B, out_feat=1] -> [B]
    _ = jnp.squeeze(out)
    print("KERNEL_OK")
</pallas_src>

<mosaic_0001>
module attributes {stable_mosaic.version = 11 : i64} {
  func.func @_kan_kernel(%arg0: i32, %arg1: memref<128x16xbf16, #tpu.memory_space<vmem>>, %arg2: memref<16x32xbf16, #tpu.memory_space<vmem>>, %arg3: memref<1x32xbf16, #tpu.memory_space<vmem>>, %arg4: memref<2x32x32xbf16, #tpu.memory_space<vmem>>, %arg5: memref<2x1x32xbf16, #tpu.memory_space<vmem>>, %arg6: memref<32x128xbf16, #tpu.memory_space<vmem>>, %arg7: memref<1x128xf32, #tpu.memory_space<vmem>>, %arg8: memref<16x128xf32, #tpu.memory_space<vmem>>) attributes {dimension_semantics = [#tpu.dimension_semantics<parallel>], iteration_bounds = array<i64: 1>, scalar_prefetch = 0 : i64, scratch_operands = 0 : i64, tpu.core_type = #tpu.core_type<tc>, window_params = [{transform_indices = @transform_0, window_bounds = array<i64: 128, 16>}, {pipeline_mode = #tpu.pipeline_mode<synchronous>, transform_indices = @transform_1, window_bounds = array<i64: 16, 32>}, {pipeline_mode = #tpu.pipeline_mode<synchronous>, transform_indices = @transform_2, window_bounds = array<i64: 1, 32>}, {pipeline_mode = #tpu.pipeline_mode<synchronous>, transform_indices = @transform_3, window_bounds = array<i64: 2, 32, 32>}, {pipeline_mode = #tpu.pipeline_mode<synchronous>, transform_indices = @transform_4, window_bounds = array<i64: 2, 1, 32>}, {pipeline_mode = #tpu.pipeline_mode<synchronous>, transform_indices = @transform_5, window_bounds = array<i64: 32, 128>}, {pipeline_mode = #tpu.pipeline_mode<synchronous>, transform_indices = @transform_6, window_bounds = array<i64: 1, 128>}, {transform_indices = @transform_7, window_bounds = array<i64: 16, 128>}]} {
    %c0 = arith.constant 0 : index
    %c0_0 = arith.constant 0 : index
    %0 = vector.load %arg1[%c0, %c0_0] : memref<128x16xbf16, #tpu.memory_space<vmem>>, vector<128x16xbf16>
    %c0_1 = arith.constant 0 : index
    %c0_2 = arith.constant 0 : index
    %1 = vector.load %arg2[%c0_1, %c0_2] : memref<16x32xbf16, #tpu.memory_space<vmem>>, vector<16x32xbf16>
    %cst = arith.constant dense<0.000000e+00> : vector<128x32xf32>
    %2 = tpu.matmul %0, %1, %cst {dimension_numbers = #tpu.dot_dimension_numbers<[1], [0], [0], [1], [0, 0, 1, 1], [], []>} : vector<128x16xbf16>, vector<16x32xbf16>, vector<128x32xf32> -> vector<128x32xf32>
    %c0_3 = arith.constant 0 : index
    %c0_4 = arith.constant 0 : index
    %3 = vector.load %arg3[%c0_3, %c0_4] : memref<1x32xbf16, #tpu.memory_space<vmem>>, vector<1x32xbf16>
    %4 = arith.truncf %2 : vector<128x32xf32> to vector<128x32xbf16>
    %5 = vector.broadcast %3 : vector<1x32xbf16> to vector<128x32xbf16>
    %6 = arith.addf %4, %5 : vector<128x32xbf16>
    %cst_5 = arith.constant 1.000980e-01 : bf16
    %7 = vector.broadcast %cst_5 : bf16 to vector<128x32xbf16>
    %8 = arith.mulf %7, %6 : vector<128x32xbf16>
    %9 = arith.maximumf %6, %8 : vector<128x32xbf16>
    %c0_6 = arith.constant 0 : index
    %c0_7 = arith.constant 0 : index
    %c0_8 = arith.constant 0 : index
    %10 = vector.load %arg4[%c0_6, %c0_7, %c0_8] : memref<2x32x32xbf16, #tpu.memory_space<vmem>>, vector<1x32x32xbf16>
    %11 = vector.shape_cast %10 : vector<1x32x32xbf16> to vector<32x32xbf16>
    %cst_9 = arith.constant dense<0.000000e+00> : vector<128x32xf32>
    %12 = tpu.matmul %9, %11, %cst_9 {dimension_numbers = #tpu.dot_dimension_numbers<[1], [0], [0], [1], [0, 0, 1, 1], [], []>} : vector<128x32xbf16>, vector<32x32xbf16>, vector<128x32xf32> -> vector<128x32xf32>
    %c0_10 = arith.constant 0 : index
    %c0_11 = arith.constant 0 : index
    %c0_12 = arith.constant 0 : index
    %13 = vector.load %arg5[%c0_10, %c0_11, %c0_12] : memref<2x1x32xbf16, #tpu.memory_space<vmem>>, vector<1x1x32xbf16>
    %14 = vector.shape_cast %13 : vector<1x1x32xbf16> to vector<1x32xbf16>
    %15 = arith.truncf %12 : vector<128x32xf32> to vector<128x32xbf16>
    %16 = vector.broadcast %14 : vector<1x32xbf16> to vector<128x32xbf16>
    %17 = arith.addf %15, %16 : vector<128x32xbf16>
    %cst_13 = arith.constant 1.000980e-01 : bf16
    %18 = vector.broadcast %cst_13 : bf16 to vector<128x32xbf16>
    %19 = arith.mulf %18, %17 : vector<128x32xbf16>
    %20 = arith.maximumf %17, %19 : vector<128x32xbf16>
    %c1 = arith.constant 1 : index
    %c0_14 = arith.constant 0 : index
    %c0_15 = arith.constant 0 : index
    %21 = vector.load %arg4[%c1, %c0_14, %c0_15] : memref<2x32x32xbf16, #tpu.memory_space<vmem>>, vector<1x32x32xbf16>
    %22 = vector.shape_cast %21 : vector<1x32x32xbf16> to vector<32x32xbf16>
    %cst_16 = arith.constant dense<0.000000e+00> : vector<128x32xf32>
    %23 = tpu.matmul %20, %22, %cst_16 {dimension_numbers = #tpu.dot_dimension_numbers<[1], [0], [0], [1], [0, 0, 1, 1], [], []>} : vector<128x32xbf16>, vector<32x32xbf16>, vector<128x32xf32> -> vector<128x32xf32>
    %c1_17 = arith.constant 1 : index
    %c0_18 = arith.constant 0 : index
    %c0_19 = arith.constant 0 : index
    %24 = vector.load %arg5[%c1_17, %c0_18, %c0_19] : memref<2x1x32xbf16, #tpu.memory_space<vmem>>, vector<1x1x32xbf16>
    %25 = vector.shape_cast %24 : vector<1x1x32xbf16> to vector<1x32xbf16>
    %26 = arith.truncf %23 : vector<128x32xf32> to vector<128x32xbf16>
    %27 = vector.broadcast %25 : vector<1x32xbf16> to vector<128x32xbf16>
    %28 = arith.addf %26, %27 : vector<128x32xbf16>
    %cst_20 = arith.constant 1.000980e-01 : bf16
    %29 = vector.broadcast %cst_20 : bf16 to vector<128x32xbf16>
    %30 = arith.mulf %29, %28 : vector<128x32xbf16>
    %31 = arith.maximumf %28, %30 : vector<128x32xbf16>
    %32 = arith.extf %31 : vector<128x32xbf16> to vector<128x32xf32>
    %33 = vector.shape_cast %32 : vector<128x32xf32> to vector<16x8x32xf32>
    %cst_21 = arith.constant dense<0.000000e+00> : vector<16x32xf32>
    %34 = vector.multi_reduction <add>, %33, %cst_21 [1] : vector<16x8x32xf32> to vector<16x32xf32>
    %35 = arith.truncf %34 : vector<16x32xf32> to vector<16x32xbf16>
    %c0_22 = arith.constant 0 : index
    %c0_23 = arith.constant 0 : index
    %36 = vector.load %arg6[%c0_22, %c0_23] : memref<32x128xbf16, #tpu.memory_space<vmem>>, vector<32x128xbf16>
    %cst_24 = arith.constant dense<0.000000e+00> : vector<16x128xf32>
    %37 = tpu.matmul %35, %36, %cst_24 {dimension_numbers = #tpu.dot_dimension_numbers<[1], [0], [0], [1], [0, 0, 1, 1], [], []>} : vector<16x32xbf16>, vector<32x128xbf16>, vector<16x128xf32> -> vector<16x128xf32>
    %c0_25 = arith.constant 0 : index
    %c0_26 = arith.constant 0 : index
    %38 = vector.load %arg7[%c0_25, %c0_26] : memref<1x128xf32, #tpu.memory_space<vmem>>, vector<1x128xf32>
    %39 = vector.broadcast %38 : vector<1x128xf32> to vector<16x128xf32>
    %40 = arith.addf %37, %39 : vector<16x128xf32>
    %c0_27 = arith.constant 0 : index
    %c0_28 = arith.constant 0 : index
    %41 = vector.load %arg8[%c0_27, %c0_28] : memref<16x128xf32, #tpu.memory_space<vmem>>, vector<16x128xf32>
    tpu.vector_store %arg8[%c0_27, %c0_28], %40 {strides = array<i32>} : memref<16x128xf32, #tpu.memory_space<vmem>>, vector<16x128xf32>,
    return
  }
  func.func @transform_0(%arg0: i32) -> (i32, i32) {
    %c0_i32 = arith.constant 0 : i32
    %c0_i32_0 = arith.constant 0 : i32
    return %arg0, %c0_i32 : i32, i32
  }
  func.func @transform_1(%arg0: i32) -> (i32, i32) {
    %c0_i32 = arith.constant 0 : i32
    %c0_i32_0 = arith.constant 0 : i32
    %c0_i32_1 = arith.constant 0 : i32
    return %c0_i32, %c0_i32_0 : i32, i32
  }
  func.func @transform_2(%arg0: i32) -> (i32, i32) {
    %c0_i32 = arith.constant 0 : i32
    %c0_i32_0 = arith.constant 0 : i32
    %c0_i32_1 = arith.constant 0 : i32
    return %c0_i32, %c0_i32_0 : i32, i32
  }
  func.func @transform_3(%arg0: i32) -> (i32, i32, i32) {
    %c0_i32 = arith.constant 0 : i32
    %c0_i32_0 = arith.constant 0 : i32
    %c0_i32_1 = arith.constant 0 : i32
    %c0_i32_2 = arith.constant 0 : i32
    return %c0_i32, %c0_i32_0, %c0_i32_1 : i32, i32, i32
  }
  func.func @transform_4(%arg0: i32) -> (i32, i32, i32) {
    %c0_i32 = arith.constant 0 : i32
    %c0_i32_0 = arith.constant 0 : i32
    %c0_i32_1 = arith.constant 0 : i32
    %c0_i32_2 = arith.constant 0 : i32
    return %c0_i32, %c0_i32_0, %c0_i32_1 : i32, i32, i32
  }
  func.func @transform_5(%arg0: i32) -> (i32, i32) {
    %c0_i32 = arith.constant 0 : i32
    %c0_i32_0 = arith.constant 0 : i32
    %c0_i32_1 = arith.constant 0 : i32
    return %c0_i32, %c0_i32_0 : i32, i32
  }
  func.func @transform_6(%arg0: i32) -> (i32, i32) {
    %c0_i32 = arith.constant 0 : i32
    %c0_i32_0 = arith.constant 0 : i32
    %c0_i32_1 = arith.constant 0 : i32
    return %c0_i32, %c0_i32_0 : i32, i32
  }
  func.func @transform_7(%arg0: i32) -> (i32, i32) {
    %c0_i32 = arith.constant 0 : i32
    %c0_i32_0 = arith.constant 0 : i32
    return %arg0, %c0_i32 : i32, i32
  }
}

</mosaic_0001>

<bundles_post_ra>
// kernel: tpu_custom_call.1
= control target key start
LH: loop header
LB: loop body
LE: loop exit
PB: predicated region body
PF: predicated region fallthrough
CT: control target
= control target key end

     0   :  { %vm93_vm0 = vcmask 130048   ;;  %s1269_s0 = inlined_call_operand.vmem [shape: bf16[128,16], index: 0, kind: input, shape index: {}]   ;;  %s1270_s1 = inlined_call_operand.vmem [shape: bf16[16,32], index: 1, kind: input, shape index: {}]   ;;  %s1271_s2 = inlined_call_operand.vmem [shape: bf16[1,32], index: 2, kind: input, shape index: {}]   ;;  %s1272_s3 = inlined_call_operand.vmem [shape: bf16[2,32,32], index: 3, kind: input, shape index: {}]   ;;  %s1273_s4 = inlined_call_operand.vmem [shape: bf16[2,1,32], index: 4, kind: input, shape index: {}]   ;;  %s1274_s5 = inlined_call_operand.vmem [shape: bf16[32,128], index: 5, kind: input, shape index: {}]   ;;  %s1275_s6 = inlined_call_operand.vmem [shape: f32[1,128], index: 6, kind: input, shape index: {}]   ;;  %s1276_s7 = inlined_call_operand.hbm [shape: f32[16,128], index: 7, kind: output, shape index: {}]  }
   0x1   :  { %v1046_v0 = vld [vmem:[%s1270_s1] sm:$0xff]   ;;  %v1048_v2 = vld [vmem:[%s1269_s0 + $0x8] sm:$0xff]   ;;  %v1049_v3 = vld [vmem:[%s1269_s0 + $0x10] sm:$0xff]  }
   0x2   :  { %v1047_v1 = vld [vmem:[%s1269_s0] sm:$0xff]   ;;  %973 = vmatprep.subr.bf16.mxu0 %v1046_v0  ;;  %1039 = vmatprep.subr.bf16.mxu1 %v1046_v0  ;;  %v1052_v4 = vld [vmem:[%s1269_s0 + $0x30] sm:$0xff]   ;;  %v1050_v5 = vld [vmem:[%s1269_s0 + $0x18] sm:$0xff]  }
   0x3   :  { %974 = vmatpush3.bf16.msra.mxu0 %v1046_v0  ;;  %975 = vmatprep.mubr.msk.bf16.mxu0 %vm93_vm0, %v1047_v1  ;;  %v1054_v6 = vld [vmem:[%s1269_s0 + $0x38] sm:$0xff]   ;;  %v1051_v7 = vld [vmem:[%s1269_s0 + $0x20] sm:$0xff]  }
   0x4   :  { %1040 = vmatpush3.bf16.msra.mxu1 %v1046_v0  ;;  %987 = vmatprep.mubr.msk.bf16.mxu1 %vm93_vm0, %v1052_v4 }
   0x6   :  { %976 = vmatmul.mubr.msk.bf16.vlgmr.msra.gmra.mxu0 %vm93_vm0, %v1048_v2 }
   0x7   :  { %979 = vmatprep.mubr.msk.bf16.mxu0 %vm93_vm0, %v1049_v3  ;;  %988 = vmatmul.mubr.msk.bf16.vlgmr.msra.gmra.mxu1 %vm93_vm0, %v1054_v6 }
   0x8   :  { %12 = vsyncpa [#allocation3], 0  ;;  %v1053_v8 = vld [vmem:[%s1269_s0 + $0x28] sm:$0xff]   ;;  %v1056_v10 = vld [vmem:[%s1272_s3] sm:$0xff]   ;;  %v227_v12 = vlaneseq  ;;  %vm271_vm1 = vcmask 261120   ;;  %vm1084_vm2 = vmmov 0  }
   0x9   :  { %v1055_v9 = vld [vmem:[%s1272_s3 + $0x8] sm:$0xff]   ;;  %v1057_v11 = vld [vmem:[%s1272_s3 + $0x18] sm:$0xff]   ;;  %v215_v14 = vld [vmem:[%s1271_s2] sm:$0x1]  ;;  %vm799_vm3 = vcmask 1041409   ;;  %vm801_vm4 = vcmask 1042434  }
   0xa   :  { %991 = vmatprep.subr.bf16.mxu1 %v1055_v9  ;;  %1011 = vmatprep.subr.bf16.mxu0 %v1057_v11  ;;  %v228_v13 = vshrl.u32 %v227_v12, 7  ;;  %v225_v15 = vpack.i.b16 %v215_v14, %v215_v14  ;;  %v1058_v2 = vld [vmem:[%s1272_s3 + $0x10] sm:$0xff]   ;;  %v393_v3 = vld [vmem:[%s1273_s4] sm:$0x1]  ;;  %vm803_vm5 = vcmask 1043459   ;;  %vm805_vm6 = vcmask 1044484  }
   0xb   :  { %992 = vmatpush3.bf16.msra.mxu1 %v1055_v9  ;;  %1012 = vmatpush3.bf16.msra.mxu0 %v1057_v11  ;;  %v403_v4 = vpack.i.b16 %v393_v3, %v393_v3  ;;  %vm807_vm7 = vcmask 1045509   ;;  %vm809_vm8 = vcmask 1046534   ;;  %vm811_vm9 = vcmask 1047559   ;;  %s1085_s9 = smov [#allocation2]  }
   0xc   :  { %993 = vmatprep.subr.bf16.mxu1 %v1056_v10  ;;  %v1175_v16 = vsub.s32 0, %v228_v13  ;;  %1013 = vmatprep.subr.bf16.mxu0 %v1058_v2  ;;  %s884_s10 = sshll.u32 %s1085_s9, 4  ;;  %s885_s10 = int_to_ptr.vmem [resolvable:$true] %s884_s10 }
   0xd   :  { %s1061_s11 = scalar_lea.vmem %s885_s10, 256  ;;  %p1066_p1 = scmp.lt.s32.totalorder %s885_s10, %s885_s10 }
   0xe   :  { %980 = vmatmul.mubr.msk.bf16.gmra.mxu0 %vm93_vm0, %v1050_v5  ;;  %v230_v19 = vrot.slane %v225_v15, %v1175_v16  ;;  %p1062_p0 = scmp.ne.s32.totalorder %s885_s10, %s1061_s11  ;;  %p1067_p2 = scmp.lt.s32.totalorder %s1061_s11, %s1061_s11 }
   0xf   :  { %983 = vmatprep.mubr.msk.bf16.mxu0 %vm93_vm0, %v1051_v7  ;;  %994 = vmatpush3.bf16.msra.mxu1 %v1056_v10  ;;  %v408_v7 = vrot.slane %v403_v4, %v1175_v16 }
  0x10   :  { %1014 = vmatpush3.bf16.msra.mxu0 %v1058_v2  ;;  %p1068_p3 = por %p1067_p2, %p1066_p1 }
  0x12   :  { %p1069_p4 = pnand %p1068_p3, %p1062_p0 }
  0x16   :  { %984 = vmatmul.mubr.msk.bf16.gmra.mxu0 %vm93_vm0, %v1053_v8 }
  0xc6   :  { %v977_v17 = vpop.f32.mrf.mxu0 }
  0xc7   :  { %v989_v21 = vpop.f32.mrf.mxu1 }
  0xc8   :  { %v152_v18 = vpop.f32.mrf.mxu0 }
  0xc9   :  { %v200_v27 = vpop.f32.mrf.mxu1 }
  0xca   :  { %v978_v20 = vpop.f32.mrf.mxu0 }
  0xcb   :  { %v217_v22 = vpack.c.bf16 %v978_v20, %v977_v17  ;;  %v990_v33 = vpop.f32.mrf.mxu1 }
  0xcc   :  { %v155_v23 = vpop.f32.mrf.mxu0  ;;  %v223_v57 = vpack.c.bf16 %v990_v33, %v989_v21 }
  0xcd   :  { %v232_v24 = vadd.bf16 %v230_v19, %v217_v22  ;;  %v216_v25 = vpack.c.bf16 %v155_v23, %v152_v18  ;;  %v203_v41 = vpop.f32.mrf.mxu1 }
  0xce   :  { %v981_v26 = vpop.f32.mrf.mxu0  ;;  %v222_v46 = vpack.c.bf16 %v203_v41, %v200_v27  ;;  %v238_v62 = vadd.bf16 %v230_v19, %v223_v57  ;;  %v1060_v57 = vld [vmem:[%s1274_s5] sm:$0xff]  }
  0xcf   :  { %v231_v28 = vadd.bf16 %v230_v19, %v216_v25  ;;  %v240_v29 = vmul.bf16 1036860877, %v232_v24 }
  0xd0   :  { %v168_v30 = vpop.f32.mrf.mxu0  ;;  %v237_v54 = vadd.bf16 %v230_v19, %v222_v46  ;;  %v246_v0 = vmul.bf16 1036860877, %v238_v62 }
  0xd1   :  { %v239_v31 = vmul.bf16 1036860877, %v231_v28  ;;  %v248_v36 = vmax.bf16 %v240_v29, %v232_v24 }
  0xd2   :  { %v982_v32 = vpop.f32.mrf.mxu0  ;;  %v245_v59 = vmul.bf16 1036860877, %v237_v54  ;;  %v254_v1 = vmax.bf16 %v246_v0, %v238_v62 }
  0xd3   :  { %v247_v34 = vmax.bf16 %v239_v31, %v231_v28  ;;  %v219_v35 = vpack.c.bf16 %v982_v32, %v981_v26 }
  0xd4   :  { %v171_v37 = vpop.f32.mrf.mxu0  ;;  %v253_v63 = vmax.bf16 %v245_v59, %v237_v54 }
  0xd5   :  { %v234_v38 = vadd.bf16 %v230_v19, %v219_v35  ;;  %v218_v39 = vpack.c.bf16 %v171_v37, %v168_v30  ;;  %995 = vmatprep.mubr.msk.bf16.mxu1 %vm271_vm1, %v247_v34 }
  0xd6   :  { %v985_v40 = vpop.f32.mrf.mxu0  ;;  %996 = vmatmul.mubr.msk.bf16.vlgmr.msra.gmra.mxu1 %vm271_vm1, %v248_v36 }
  0xd7   :  { %v233_v42 = vadd.bf16 %v230_v19, %v218_v39  ;;  %v242_v43 = vmul.bf16 1036860877, %v234_v38 }
  0xd8   :  { %v184_v44 = vpop.f32.mrf.mxu0 }
  0xd9   :  { %v241_v45 = vmul.bf16 1036860877, %v233_v42  ;;  %v250_v50 = vmax.bf16 %v242_v43, %v234_v38 }
  0xda   :  { %v986_v47 = vpop.f32.mrf.mxu0 }
  0xdb   :  { %v249_v48 = vmax.bf16 %v241_v45, %v233_v42  ;;  %v221_v49 = vpack.c.bf16 %v986_v47, %v985_v40 }
  0xdc   :  { %v187_v51 = vpop.f32.mrf.mxu0 }
  0xdd   :  { %v236_v52 = vadd.bf16 %v230_v19, %v221_v49  ;;  %v220_v53 = vpack.c.bf16 %v187_v51, %v184_v44  ;;  %999 = vmatprep.mubr.msk.bf16.mxu1 %vm271_vm1, %v249_v48 }
  0xde   :  { %1000 = vmatmul.mubr.msk.bf16.gmra.mxu1 %vm271_vm1, %v250_v50 }
  0xdf   :  { %v235_v55 = vadd.bf16 %v230_v19, %v220_v53  ;;  %v244_v56 = vmul.bf16 1036860877, %v236_v52 }
  0xe1   :  { %v243_v58 = vmul.bf16 1036860877, %v235_v55  ;;  %v252_v61 = vmax.bf16 %v244_v56, %v236_v52  ;;  %v1083_v56 = vmov 0.0  }
  0xe2   :  { %1031 = vmatprep.subr.bf16.mxu1 %v1083_v56 }
  0xe3   :  { %v251_v60 = vmax.bf16 %v243_v58, %v235_v55  ;;  %v1059_v55 = vld [vmem:[%s1274_s5 + $0x8] sm:$0xff]   ;;  %v936_v58 = vld [vmem:[%s1273_s4 + $0x1] sm:$0x1] }
  0xe4   :  { %1032 = vmatpush3.bf16.msra.mxu1 %v1059_v55  ;;  %v582_v59 = vpack.i.b16 %v936_v58, %v936_v58 }
  0xe5   :  { %1003 = vmatprep.mubr.msk.bf16.mxu1 %vm271_vm1, %v251_v60  ;;  %1033 = vmatprep.subr.bf16.mxu1 %v1083_v56 }
  0xe6   :  { %1004 = vmatmul.mubr.msk.bf16.gmra.mxu1 %vm271_vm1, %v252_v61  ;;  %v1211_v62 = vrot.slane %v582_v59, %v1175_v16 }
  0xe7   :  { %1007 = vmatprep.mubr.msk.bf16.mxu1 %vm271_vm1, %v253_v63 }
  0xe8   :  { %1034 = vmatpush3.bf16.msra.mxu1 %v1060_v57 }
  0xee   :  { %1008 = vmatmul.mubr.msk.bf16.gmra.mxu1 %vm271_vm1, %v254_v1 }
  0xef   :  { %1035 = vmatprep.mubr.msk.bf16.mxu1 %vm1084_vm2, %v1083_v56 }
 0x196   :  { %v997_v5 = vpop.f32.mrf.mxu1 }
 0x198   :  { %v330_v6 = vpop.f32.mrf.mxu1 }
 0x19a   :  { %v998_v8 = vpop.f32.mrf.mxu1 }
 0x19b   :  { %v395_v9 = vpack.c.bf16 %v998_v8, %v997_v5 }
 0x19c   :  { %v333_v10 = vpop.f32.mrf.mxu1 }
 0x19d   :  { %v410_v11 = vadd.bf16 %v408_v7, %v395_v9  ;;  %v394_v12 = vpack.c.bf16 %v333_v10, %v330_v6 }
 0x19e   :  { %v1001_v13 = vpop.f32.mrf.mxu1 }
 0x19f   :  { %v409_v14 = vadd.bf16 %v408_v7, %v394_v12  ;;  %v418_v15 = vmul.bf16 1036860877, %v410_v11 }
 0x1a0   :  { %v346_v17 = vpop.f32.mrf.mxu1 }
 0x1a1   :  { %v417_v18 = vmul.bf16 1036860877, %v409_v14  ;;  %v426_v22 = vmax.bf16 %v418_v15, %v410_v11 }
 0x1a2   :  { %v1002_v19 = vpop.f32.mrf.mxu1 }
 0x1a3   :  { %v425_v20 = vmax.bf16 %v417_v18, %v409_v14  ;;  %v397_v21 = vpack.c.bf16 %v1002_v19, %v1001_v13 }
 0x1a4   :  { %v349_v23 = vpop.f32.mrf.mxu1 }
 0x1a5   :  { %v412_v24 = vadd.bf16 %v408_v7, %v397_v21  ;;  %v396_v25 = vpack.c.bf16 %v349_v23, %v346_v17  ;;  %1015 = vmatprep.mubr.msk.bf16.mxu0 %vm271_vm1, %v425_v20 }
 0x1a6   :  { %v1005_v26 = vpop.f32.mrf.mxu1  ;;  %1016 = vmatmul.mubr.msk.bf16.vlgmr.msra.gmra.mxu0 %vm271_vm1, %v426_v22 }
 0x1a7   :  { %v411_v27 = vadd.bf16 %v408_v7, %v396_v25  ;;  %v420_v28 = vmul.bf16 1036860877, %v412_v24 }
 0x1a8   :  { %v362_v29 = vpop.f32.mrf.mxu1 }
 0x1a9   :  { %v419_v30 = vmul.bf16 1036860877, %v411_v27  ;;  %v428_v34 = vmax.bf16 %v420_v28, %v412_v24 }
 0x1aa   :  { %v1006_v31 = vpop.f32.mrf.mxu1 }
 0x1ab   :  { %v427_v32 = vmax.bf16 %v419_v30, %v411_v27  ;;  %v399_v33 = vpack.c.bf16 %v1006_v31, %v1005_v26 }
 0x1ac   :  { %v365_v35 = vpop.f32.mrf.mxu1 }
 0x1ad   :  { %v414_v36 = vadd.bf16 %v408_v7, %v399_v33  ;;  %v398_v37 = vpack.c.bf16 %v365_v35, %v362_v29  ;;  %1019 = vmatprep.mubr.msk.bf16.mxu0 %vm271_vm1, %v427_v32 }
 0x1ae   :  { %v1009_v38 = vpop.f32.mrf.mxu1  ;;  %1020 = vmatmul.mubr.msk.bf16.gmra.mxu0 %vm271_vm1, %v428_v34 }
 0x1af   :  { %v413_v39 = vadd.bf16 %v408_v7, %v398_v37  ;;  %v422_v40 = vmul.bf16 1036860877, %v414_v36 }
 0x1b0   :  { %v378_v41 = vpop.f32.mrf.mxu1 }
 0x1b1   :  { %v421_v42 = vmul.bf16 1036860877, %v413_v39  ;;  %v430_v46 = vmax.bf16 %v422_v40, %v414_v36 }
 0x1b2   :  { %v1010_v43 = vpop.f32.mrf.mxu1 }
 0x1b3   :  { %v429_v44 = vmax.bf16 %v421_v42, %v413_v39  ;;  %v401_v45 = vpack.c.bf16 %v1010_v43, %v1009_v38 }
 0x1b4   :  { %v381_v47 = vpop.f32.mrf.mxu1 }
 0x1b5   :  { %v416_v48 = vadd.bf16 %v408_v7, %v401_v45  ;;  %v400_v49 = vpack.c.bf16 %v381_v47, %v378_v41  ;;  %1023 = vmatprep.mubr.msk.bf16.mxu0 %vm271_vm1, %v429_v44 }
 0x1b6   :  { %1024 = vmatmul.mubr.msk.bf16.gmra.mxu0 %vm271_vm1, %v430_v46 }
 0x1b7   :  { %v415_v50 = vadd.bf16 %v408_v7, %v400_v49  ;;  %v424_v51 = vmul.bf16 1036860877, %v416_v48 }
 0x1b9   :  { %v423_v52 = vmul.bf16 1036860877, %v415_v50  ;;  %v432_v54 = vmax.bf16 %v424_v51, %v416_v48 }
 0x1bb   :  { %v431_v53 = vmax.bf16 %v423_v52, %v415_v50 }
 0x1bd   :  { %1027 = vmatprep.mubr.msk.bf16.mxu0 %vm271_vm1, %v431_v53 }
 0x1be   :  { %1028 = vmatmul.mubr.msk.bf16.gmra.mxu0 %vm271_vm1, %v432_v54 }
 0x266   :  { %v1017_v60 = vpop.f32.mrf.mxu0 }
 0x268   :  { %v508_v61 = vpop.f32.mrf.mxu0 }
 0x26a   :  { %v1018_v63 = vpop.f32.mrf.mxu0 }
 0x26b   :  { %v574_v0 = vpack.c.bf16 %v1018_v63, %v1017_v60 }
 0x26c   :  { %v511_v1 = vpop.f32.mrf.mxu0 }
 0x26d   :  { %v589_v2 = vadd.bf16 %v1211_v62, %v574_v0  ;;  %v573_v3 = vpack.c.bf16 %v511_v1, %v508_v61 }
 0x26e   :  { %v1021_v4 = vpop.f32.mrf.mxu0 }
 0x26f   :  { %v597_v5 = vmul.bf16 1036860877, %v589_v2  ;;  %v588_v6 = vadd.bf16 %v1211_v62, %v573_v3 }
 0x270   :  { %v524_v7 = vpop.f32.mrf.mxu0 }
 0x271   :  { %v605_v8 = vmax.bf16 %v597_v5, %v589_v2  ;;  %v596_v9 = vmul.bf16 1036860877, %v588_v6 }
 0x272   :  { %v1022_v10 = vpop.f32.mrf.mxu0 }
 0x273   :  { %v614_v11 = vunpack.c.l.bf16 %v605_v8  ;;  %v615_v12 = vunpack.c.h.bf16 %v605_v8  ;;  %v604_v13 = vmax.bf16 %v596_v9, %v588_v6  ;;  %v576_v14 = vpack.c.bf16 %v1022_v10, %v1021_v4 }
 0x274   :  { %v527_v16 = vpop.f32.mrf.mxu0 }
 0x275   :  { %v642_v15 = vsel %vm271_vm1, %v614_v11, 0.0  ;;  %v649_v17 = vsel %vm271_vm1, %v615_v12, 0.0  ;;  %v612_v18 = vunpack.c.l.bf16 %v604_v13  ;;  %v613_v19 = vunpack.c.h.bf16 %v604_v13 }
 0x276   :  { %v643_v20 = vrot.slane %v642_v15, 4  ;;  %v650_v21 = vrot.slane %v649_v17, 4  ;;  %v575_v22 = vpack.c.bf16 %v527_v16, %v524_v7  ;;  %v1025_v23 = vpop.f32.mrf.mxu0  ;;  %v591_v25 = vadd.bf16 %v1211_v62, %v576_v14 }
 0x277   :  { %v628_v24 = vsel %vm271_vm1, %v612_v18, 0.0  ;;  %v635_v26 = vsel %vm271_vm1, %v613_v19, 0.0 }
 0x278   :  { %v540_v27 = vpop.f32.mrf.mxu0  ;;  %v644_v28 = vadd.f32 %v643_v20, %v642_v15  ;;  %v651_v29 = vadd.f32 %v650_v21, %v649_v17  ;;  %v590_v30 = vadd.bf16 %v1211_v62, %v575_v22  ;;  %v629_v31 = vrot.slane %v628_v24, 4 }
 0x279   :  { %v636_v33 = vrot.slane %v635_v26, 4  ;;  %v599_v34 = vmul.bf16 1036860877, %v591_v25 }
 0x27a   :  { %v1026_v32 = vpop.f32.mrf.mxu0  ;;  %v598_v35 = vmul.bf16 1036860877, %v590_v30  ;;  %v645_v37 = vrot.slane %v644_v28, 2  ;;  %v652_v38 = vrot.slane %v651_v29, 2  ;;  %v630_v40 = vadd.f32 %v629_v31, %v628_v24 }
 0x27b   :  { %v578_v41 = vpack.c.bf16 %v1026_v32, %v1025_v23  ;;  %v637_v43 = vadd.f32 %v636_v33, %v635_v26  ;;  %v607_v44 = vmax.bf16 %v599_v34, %v591_v25 }
 0x27c   :  { %v543_v36 = vpop.f32.mrf.mxu0  ;;  %v606_v39 = vmax.bf16 %v598_v35, %v590_v30  ;;  %v646_v45 = vadd.f32 %v645_v37, %v644_v28  ;;  %v653_v46 = vadd.f32 %v652_v38, %v651_v29  ;;  %v631_v49 = vrot.slane %v630_v40, 2 }
 0x27d   :  { %v593_v50 = vadd.bf16 %v1211_v62, %v578_v41  ;;  %v638_v51 = vrot.slane %v637_v43, 2  ;;  %v618_v52 = vunpack.c.l.bf16 %v607_v44  ;;  %v619_v53 = vunpack.c.h.bf16 %v607_v44 }
 0x27e   :  { %v1029_v42 = vpop.f32.mrf.mxu0  ;;  %v616_v47 = vunpack.c.l.bf16 %v606_v39  ;;  %v617_v54 = vunpack.c.h.bf16 %v606_v39  ;;  %v647_v55 = vrot.slane %v646_v45, 1  ;;  %v654_v56 = vrot.slane %v653_v46, 1 }
 0x27f   :  { %v632_v59 = vadd.f32 %v631_v49, %v630_v40  ;;  %v601_v60 = vmul.bf16 1036860877, %v593_v50  ;;  %v577_v61 = vpack.c.bf16 %v543_v36, %v540_v27  ;;  %v639_v63 = vadd.f32 %v638_v51, %v637_v43 }
 0x280   :  { %v1221_v48 = vpop.f32.mrf.mxu0  ;;  %v656_v57 = vsel %vm271_vm1, %v616_v47, 0.0  ;;  %v670_v0 = vsel %vm271_vm1, %v618_v52, 0.0  ;;  %v677_v1 = vsel %vm271_vm1, %v619_v53, 0.0  ;;  %v663_v2 = vsel %vm271_vm1, %v617_v54, 0.0 }
 0x281   :  { %v657_v3 = vrot.slane %v656_v57, 4  ;;  %v609_v4 = vmax.bf16 %v601_v60, %v593_v50  ;;  %v592_v5 = vadd.bf16 %v1211_v62, %v577_v61  ;;  %v648_v7 = vadd.f32 %v647_v55, %v646_v45 }
 0x282   :  { %v1030_v58 = vpop.f32.mrf.mxu0  ;;  %v1229_v8 = vadd.f32 %v654_v56, %v653_v46  ;;  %v633_v9 = vrot.slane %v632_v59, 1  ;;  %v664_v10 = vrot.slane %v663_v2, 4  ;;  %v640_v13 = vrot.slane %v639_v63, 1 }
 0x283   :  { %v580_v6 = vpack.c.bf16 %v1030_v58, %v1029_v42  ;;  %v622_v11 = vunpack.c.l.bf16 %v609_v4  ;;  %v623_v12 = vunpack.c.h.bf16 %v609_v4  ;;  %v671_v14 = vrot.slane %v670_v0, 4 }
 0x284   :  { %v678_v16 = vrot.slane %v677_v1, 4  ;;  %v600_v15 = vmul.bf16 1036860877, %v592_v5  ;;  %v658_v17 = vadd.f32 %v657_v3, %v656_v57  ;;  %v742_v21 = vpack.c.bf16 %v648_v7, %v648_v7  ;;  %v559_v27 = vpop.f32.mrf.mxu0 }
 0x285   :  { %v698_v18 = vsel %vm271_vm1, %v622_v11, 0.0  ;;  %v705_v19 = vsel %vm271_vm1, %v623_v12, 0.0  ;;  %v595_v20 = vadd.bf16 %v1211_v62, %v580_v6  ;;  %v634_v23 = vadd.f32 %v633_v9, %v632_v59 }
 0x286   :  { %v699_v22 = vrot.slane %v698_v18, 4  ;;  %v665_v24 = vadd.f32 %v664_v10, %v663_v2  ;;  %v608_v25 = vmax.bf16 %v600_v15, %v592_v5  ;;  %v743_v28 = vpack.c.bf16 %v1229_v8, %v1229_v8 }
 0x287   :  { %v603_v26 = vmul.bf16 1036860877, %v595_v20  ;;  %v641_v29 = vadd.f32 %v640_v13, %v639_v63  ;;  %v672_v30 = vadd.f32 %v671_v14, %v670_v0  ;;  %v706_v31 = vrot.slane %v705_v19, 4 }
 0x288   :  { %v679_v32 = vadd.f32 %v678_v16, %v677_v1  ;;  %v659_v33 = vrot.slane %v658_v17, 2  ;;  %v620_v34 = vunpack.c.l.bf16 %v608_v25  ;;  %v621_v35 = vunpack.c.h.bf16 %v608_v25 }
 0x289   :  { %v1236_v36 = vunpack.c.l.b16 %v742_v21  ;;  %v700_v37 = vadd.f32 %v699_v22, %v698_v18  ;;  %v611_v38 = vmax.bf16 %v603_v26, %v595_v20  ;;  %v579_v39 = vpack.c.bf16 %v559_v27, %v1221_v48 }
 0x28a   :  { %v740_v40 = vpack.c.bf16 %v634_v23, %v634_v23  ;;  %v666_v41 = vrot.slane %v665_v24, 2  ;;  %v684_v42 = vsel %vm271_vm1, %v620_v34, 0.0  ;;  %v691_v43 = vsel %vm271_vm1, %v621_v35, 0.0 }
 0x28b   :  { %v741_v44 = vpack.c.bf16 %v641_v29, %v641_v29  ;;  %v707_v45 = vadd.f32 %v706_v31, %v705_v19  ;;  %v685_v46 = vrot.slane %v684_v42, 4  ;;  %v692_v47 = vrot.slane %v691_v43, 4 }
 0x28c   :  { %v673_v49 = vrot.slane %v672_v30, 2  ;;  %v660_v50 = vadd.f32 %v659_v33, %v658_v17  ;;  %v626_v51 = vunpack.c.l.bf16 %v611_v38  ;;  %v627_v52 = vunpack.c.h.bf16 %v611_v38 }
 0x28d   :  { %v701_v53 = vrot.slane %v700_v37, 2  ;;  %v686_v54 = vadd.f32 %v685_v46, %v684_v42  ;;  %v693_v55 = vadd.f32 %v692_v47, %v691_v43  ;;  %v594_v48 = vadd.bf16 %v1211_v62, %v579_v39 }
 0x28e   :  { %v680_v56 = vrot.slane %v679_v32, 2  ;;  %v667_v57 = vadd.f32 %v666_v41, %v665_v24  ;;  %v726_v58 = vsel %vm271_vm1, %v626_v51, 0.0  ;;  %v733_v59 = vsel %vm271_vm1, %v627_v52, 0.0 }
 0x28f   :  { %v708_v60 = vrot.slane %v707_v45, 2  ;;  %v687_v61 = vrot.slane %v686_v54, 2  ;;  %v694_v63 = vrot.slane %v693_v55, 2  ;;  %v727_v0 = vrot.slane %v726_v58, 4 }
 0x290   :  { %v783_v1 = vunpack.c.l.b16 %v740_v40  ;;  %v661_v2 = vrot.slane %v660_v50, 1  ;;  %v734_v3 = vrot.slane %v733_v59, 4  ;;  %v602_v4 = vmul.bf16 1036860877, %v594_v48 }
 0x291   :  { %v702_v5 = vadd.f32 %v701_v53, %v700_v37  ;;  %v688_v6 = vadd.f32 %v687_v61, %v686_v54  ;;  %v695_v7 = vadd.f32 %v694_v63, %v693_v55  ;;  %v728_v9 = vadd.f32 %v727_v0, %v726_v58 }
 0x292   :  { %v784_v62 = vunpack.c.l.b16 %v741_v44  ;;  %v668_v10 = vrot.slane %v667_v57, 1  ;;  %v735_v11 = vadd.f32 %v734_v3, %v733_v59  ;;  %v610_v12 = vmax.bf16 %v602_v4, %v594_v48 }
 0x293   :  { %v709_v13 = vadd.f32 %v708_v60, %v707_v45  ;;  %v689_v14 = vrot.slane %v688_v6, 1  ;;  %v696_v16 = vrot.slane %v695_v7, 1  ;;  %v729_v15 = vrot.slane %v728_v9, 2 }
 0x294   :  { %v674_v17 = vadd.f32 %v673_v49, %v672_v30  ;;  %v736_v18 = vrot.slane %v735_v11, 2  ;;  %v624_v19 = vunpack.c.l.bf16 %v610_v12  ;;  %v625_v20 = vunpack.c.h.bf16 %v610_v12 }
 0x295   :  { %v662_v21 = vadd.f32 %v661_v2, %v660_v50  ;;  %v703_v22 = vrot.slane %v702_v5, 1  ;;  %v690_v23 = vadd.f32 %v689_v14, %v688_v6  ;;  %v697_v24 = vadd.f32 %v696_v16, %v695_v7 }
 0x296   :  { %v800_v25 = vsel %vm799_vm3, %v784_v62, %v783_v1  ;;  %v681_v26 = vadd.f32 %v680_v56, %v679_v32  ;;  %v712_v27 = vsel %vm271_vm1, %v624_v19, 0.0  ;;  %v719_v29 = vsel %vm271_vm1, %v625_v20, 0.0 }
 0x297   :  { %v669_v31 = vadd.f32 %v668_v10, %v667_v57  ;;  %v710_v33 = vrot.slane %v709_v13, 1  ;;  %v730_v34 = vadd.f32 %v729_v15, %v728_v9  ;;  %v713_v35 = vrot.slane %v712_v27, 4 }
 0x298   :  { %v748_v37 = vpack.c.bf16 %v690_v23, %v690_v23  ;;  %v749_v30 = vpack.c.bf16 %v697_v24, %v697_v24  ;;  %v737_v38 = vadd.f32 %v736_v18, %v735_v11  ;;  %v720_v39 = vrot.slane %v719_v29, 4 }
 0x299   :  { %v675_v40 = vrot.slane %v674_v17, 1  ;;  %v744_v41 = vpack.c.bf16 %v662_v21, %v662_v21  ;;  %v704_v42 = vadd.f32 %v703_v22, %v702_v5  ;;  %v714_v43 = vadd.f32 %v713_v35, %v712_v27 }
 0x29a   :  { %v786_v32 = vunpack.c.l.b16 %v743_v28  ;;  %v802_v44 = vsel %vm801_vm4, %v1236_v36, %v800_v25  ;;  %v682_v45 = vrot.slane %v681_v26, 1  ;;  %v721_v46 = vadd.f32 %v720_v39, %v719_v29 }
 0x29b   :  { %v745_v47 = vpack.c.bf16 %v669_v31, %v669_v31  ;;  %v711_v49 = vadd.f32 %v710_v33, %v709_v13  ;;  %v731_v50 = vrot.slane %v730_v34, 1  ;;  %v715_v51 = vrot.slane %v714_v43, 2  ;;  %v937_v33 = vld [vmem:[%s1275_s6] ss:$0 sm:$0xff] }
 0x29c   :  { %v791_v52 = vunpack.c.l.b16 %v748_v37  ;;  %v792_v53 = vunpack.c.l.b16 %v749_v30  ;;  %v738_v54 = vrot.slane %v737_v38, 1  ;;  %v722_v55 = vrot.slane %v721_v46, 2 }
 0x29d   :  { %v676_v48 = vadd.f32 %v675_v40, %v674_v17  ;;  %v787_v56 = vunpack.c.l.b16 %v744_v41  ;;  %v750_v57 = vpack.c.bf16 %v704_v42, %v704_v42  ;;  %v716_v58 = vadd.f32 %v715_v51, %v714_v43 }
 0x29e   :  { %v804_v8 = vsel %vm803_vm5, %v786_v32, %v802_v44  ;;  %v723_v28 = vadd.f32 %v722_v55, %v721_v46  ;;  %v683_v36 = vadd.f32 %v682_v45, %v681_v26  ;;  %v788_v59 = vunpack.c.l.b16 %v745_v47 }
 0x29f   :  { %v732_v60 = vadd.f32 %v731_v50, %v730_v34  ;;  %v717_v61 = vrot.slane %v716_v58, 1  ;;  %v751_v63 = vpack.c.bf16 %v711_v49, %v711_v49  ;;  %v813_v0 = vsel %vm799_vm3, %v792_v53, %v791_v52 }
 0x2a0   :  { %v739_v1 = vadd.f32 %v738_v54, %v737_v38  ;;  %v724_v2 = vrot.slane %v723_v28, 1  ;;  %v746_v3 = vpack.c.bf16 %v676_v48, %v676_v48  ;;  %v806_v4 = vsel %vm805_vm6, %v787_v56, %v804_v8 }
 0x2a1   :  { %v793_v5 = vunpack.c.l.b16 %v750_v57  ;;  %v718_v6 = vadd.f32 %v717_v61, %v716_v58  ;;  %v747_v9 = vpack.c.bf16 %v683_v36, %v683_v36  ;;  %v754_v10 = vpack.c.bf16 %v732_v60, %v732_v60 }
 0x2a2   :  { %v725_v7 = vadd.f32 %v724_v2, %v723_v28  ;;  %v808_v12 = vsel %vm807_vm7, %v788_v59, %v806_v4  ;;  %v794_v13 = vunpack.c.l.b16 %v751_v63  ;;  %v755_v14 = vpack.c.bf16 %v739_v1, %v739_v1 }
 0x2a3   :  { %v814_v62 = vsel %vm801_vm4, %v793_v5, %v813_v0  ;;  %v752_v11 = vpack.c.bf16 %v718_v6, %v718_v6  ;;  %v789_v15 = vunpack.c.l.b16 %v746_v3  ;;  %v797_v20 = vunpack.c.l.b16 %v754_v10 }
 0x2a4   :  { %v753_v16 = vpack.c.bf16 %v725_v7, %v725_v7  ;;  %v815_v19 = vsel %vm803_vm5, %v794_v13, %v814_v62  ;;  %v790_v23 = vunpack.c.l.b16 %v747_v9  ;;  %v798_v24 = vunpack.c.l.b16 %v755_v14 }
 0x2a5   :  { %v795_v17 = vunpack.c.l.b16 %v752_v11  ;;  %v810_v22 = vsel %vm809_vm8, %v789_v15, %v808_v12 }
 0x2a6   :  { %v796_v18 = vunpack.c.l.b16 %v753_v16  ;;  %v812_v27 = vsel %vm811_vm9, %v790_v23, %v810_v22 }
 0x2a7   :  { %v816_v21 = vsel %vm805_vm6, %v795_v17, %v815_v19 }
 0x2a8   :  { %v817_v25 = vsel %vm807_vm7, %v796_v18, %v816_v21 }
 0x2a9   :  { %v818_v26 = vsel %vm809_vm8, %v797_v20, %v817_v25 }
 0x2aa   :  { %v819_v29 = vsel %vm811_vm9, %v798_v24, %v818_v26 }
 0x2ab   :  { %v820_v31 = vpack.c.b16 %v819_v29, %v812_v27 }
 0x2ad   :  { %1036 = vmatmul.mubr.msk.bf16.vlgmr.msra.gmra.mxu1 %vm271_vm1, %v820_v31 }
 0x36d   :  { %v870_v34 = vpop.f32.mrf.mxu1 }
 0x36e   :  { %v871_v35 = vadd.f32 %v937_v33, %v870_v34 }
 0x36f   :  { %v1037_v37 = vpop.f32.mrf.mxu1 }
 0x370   :  { %877 = vst [vmem:[#allocation2] sm:$0xff] %v871_v35 }
 0x371   :  { %v873_v30 = vpop.f32.mrf.mxu1 }
 0x372   :  { %v874_v38 = vadd.f32 %v937_v33, %v873_v30 }
 0x373   :  { %v1038_v39 = vpop.f32.mrf.mxu1 }
 0x374   :  { %878 = vst [vmem:[#allocation2 + $0x8] sm:$0xff] %v874_v38 }
 0x375   :  { %1072 = shalt.err (!%p1069_p4)
}
 0x376   :  { %s1086_s12 = smov 128   ;;  %s1087_s6 = smov 8  }
 0x377   :  { %890 = dma.vmem_to_hbm [thread:$0]  %s885_s10, 256, %s1276_s7, [#allocation3], %s1086_s12, %s1086_s12, %s1087_s6  }
 0x378   :  { %1081 = dma.done.wait [#allocation3], 256  }
 0x379   :  { %1082 = vsyncadd [#allocation3], 4294967040 }
 0x37a   :  { %894 = vsyncpa [#allocation3], 1 }

</bundles_post_ra>
